<compile_context>
chip_gen: v7x
topology: tpu7x:2x2x1
jax: 0.10.0
libtpu: 0.0.40
codegen_flags: <defaults>
</compile_context>

<pallas_src>
import jax
import jax.numpy as jnp
from jax.experimental import pallas as pl
from jax.experimental.pallas import tpu as pltpu

_LANE = 128   # lane width  (last dim)
_SUBLANE = 8  # sublane width (second-to-last dim)


def _round_up(x: int, m: int) -> int:
    return ((x + m - 1) // m) * m


def _pooler_kernel(x_ref, w_ref, b_ref, o_ref):
    # x_ref: (TB, Hv)   w_ref: (Hv, Hb_p)   b_ref: (1, Hb_p)   o_ref: (TB, Hb_p)
    y = jnp.dot(x_ref[...], w_ref[...],
                preferred_element_type=jnp.float32)          # MXU, f32 accumulate
    y = y + b_ref[...].astype(jnp.float32)                   # bias broadcast over batch
    o_ref[...] = jnp.maximum(y, 0.0).astype(o_ref.dtype)     # ReLU + single cast at store


def bert_image_pooler(hidden_states, weight_t, bias, *, batch_tile=128):
    """hidden_states: (B, S, Hv), weight_t: (Hv, Hb), bias: (Hb,) -> (B, Hb)."""
    B, S, Hv = hidden_states.shape
    Hb = weight_t.shape[1]
    out_dtype = hidden_states.dtype
    itemsize = jnp.dtype(out_dtype).itemsize

    # --- Select the first token OUTSIDE the kernel: only (B, Hv) is ever DMA'd. ---
    x0 = hidden_states[:, 0, :]                               # (B, Hv)

    # --- Lane-dense output: pad Hb up to a multiple of 128 (unmasked vector stores).
    #     In production the params would be pre-padded once; here it's per-call.
    Hb_p = _round_up(Hb, _LANE)
    if Hb_p != Hb:
        weight_t = jnp.pad(weight_t, ((0, 0), (0, Hb_p - Hb)))
        bias = jnp.pad(bias, (0, Hb_p - Hb))
    bias2d = bias.reshape(1, Hb_p)

    # --- Batch tile: sublane-aligned, capped at batch_tile; pad B to a multiple of TB.
    TB = min(batch_tile, _round_up(B, _SUBLANE))
    B_p = _round_up(B, TB)
    if B_p != B:
        x0 = jnp.pad(x0, ((0, B_p - B), (0, 0)))

    grid = (B_p // TB,)

    cost = pl.CostEstimate(
        flops=2 * B_p * Hv * Hb_p,
        transcendentals=0,
        bytes_accessed=(B_p * Hv + Hv * Hb_p + Hb_p + B_p * Hb_p) * itemsize,
    )

    out = pl.pallas_call(
        _pooler_kernel,
        out_shape=jax.ShapeDtypeStruct((B_p, Hb_p), out_dtype),
        grid=grid,
        in_specs=[
            pl.BlockSpec((TB, Hv), lambda i: (i, 0)),      # x tile marches over batch
            pl.BlockSpec((Hv, Hb_p), lambda i: (0, 0)),    # weight resident across batch
            pl.BlockSpec((1, Hb_p), lambda i: (0, 0)),     # bias resident across batch
        ],
        out_specs=pl.BlockSpec((TB, Hb_p), lambda i: (i, 0)),
        compiler_params=pltpu.CompilerParams(
            dimension_semantics=("parallel",),             # shard batch across TCs (v7x)
        ),
        cost_estimate=cost,
    )(x0, weight_t, bias2d)

    # Strip batch / lane padding.
    return out[:B, :Hb]


if __name__ == "__main__":
    # Small config consistent with the module: v_hidden_size=32, bi_hidden_size=32.
    B, S, V_HIDDEN, BI_HIDDEN = 2, 8, 32, 32

    key = jax.random.PRNGKey(0)
    k_x, k_w, k_b = jax.random.split(key, 3)

    hidden_states = jax.random.normal(k_x, (B, S, V_HIDDEN), dtype=jnp.float32)
    # Deterministic "nn.Linear"-style params (weight stored as (in, out) for the kernel).
    weight_t = (jax.random.normal(k_w, (V_HIDDEN, BI_HIDDEN), dtype=jnp.float32)
                / jnp.sqrt(V_HIDDEN))
    bias = jax.random.normal(k_b, (BI_HIDDEN,), dtype=jnp.float32) * 0.01

    out = bert_image_pooler(hidden_states, weight_t, bias)
    out = jax.block_until_ready(out)

    # Reference check in plain JAX (same math as the PyTorch forward).
    ref = jnp.maximum(hidden_states[:, 0] @ weight_t + bias, 0.0)
    assert out.shape == (B, BI_HIDDEN)
    assert jnp.allclose(out, ref, atol=1e-5, rtol=1e-5)

    print("KERNEL_OK")
</pallas_src>

<mosaic_0001>
module attributes {stable_mosaic.version = 11 : i64} {
  func.func @_pooler_kernel(%arg0: i32, %arg1: memref<8x32xf32, #tpu.memory_space<vmem>>, %arg2: memref<32x128xf32, #tpu.memory_space<vmem>>, %arg3: memref<1x128xf32, #tpu.memory_space<vmem>>, %arg4: memref<8x128xf32, #tpu.memory_space<vmem>>) attributes {dimension_semantics = [#tpu.dimension_semantics<parallel>], iteration_bounds = array<i64: 1>, scalar_prefetch = 0 : i64, scratch_operands = 0 : i64, tpu.core_type = #tpu.core_type<tc>, window_params = [{transform_indices = @transform_0, window_bounds = array<i64: 8, 32>}, {pipeline_mode = #tpu.pipeline_mode<synchronous>, transform_indices = @transform_1, window_bounds = array<i64: 32, 128>}, {pipeline_mode = #tpu.pipeline_mode<synchronous>, transform_indices = @transform_2, window_bounds = array<i64: 1, 128>}, {transform_indices = @transform_3, window_bounds = array<i64: 8, 128>}]} {
    %c0 = arith.constant 0 : index
    %c0_0 = arith.constant 0 : index
    %0 = vector.load %arg1[%c0, %c0_0] : memref<8x32xf32, #tpu.memory_space<vmem>>, vector<8x32xf32>
    %c0_1 = arith.constant 0 : index
    %c0_2 = arith.constant 0 : index
    %1 = vector.load %arg2[%c0_1, %c0_2] : memref<32x128xf32, #tpu.memory_space<vmem>>, vector<32x128xf32>
    %cst = arith.constant dense<0.000000e+00> : vector<8x128xf32>
    %2 = tpu.matmul %0, %1, %cst {dimension_numbers = #tpu.dot_dimension_numbers<[1], [0], [0], [1], [0, 0, 1, 1], [], []>} : vector<8x32xf32>, vector<32x128xf32>, vector<8x128xf32> -> vector<8x128xf32>
    %c0_3 = arith.constant 0 : index
    %c0_4 = arith.constant 0 : index
    %3 = vector.load %arg3[%c0_3, %c0_4] : memref<1x128xf32, #tpu.memory_space<vmem>>, vector<1x128xf32>
    %4 = vector.broadcast %3 : vector<1x128xf32> to vector<8x128xf32>
    %5 = arith.addf %2, %4 : vector<8x128xf32>
    %cst_5 = arith.constant 0.000000e+00 : f32
    %6 = vector.broadcast %cst_5 : f32 to vector<8x128xf32>
    %7 = arith.maximumf %5, %6 : vector<8x128xf32>
    %c0_6 = arith.constant 0 : index
    %c0_7 = arith.constant 0 : index
    %8 = vector.load %arg4[%c0_6, %c0_7] : memref<8x128xf32, #tpu.memory_space<vmem>>, vector<8x128xf32>
    tpu.vector_store %arg4[%c0_6, %c0_7], %7 {strides = array<i32>} : memref<8x128xf32, #tpu.memory_space<vmem>>, vector<8x128xf32>,
    return
  }
  func.func @transform_0(%arg0: i32) -> (i32, i32) {
    %c0_i32 = arith.constant 0 : i32
    %c0_i32_0 = arith.constant 0 : i32
    return %arg0, %c0_i32 : i32, i32
  }
  func.func @transform_1(%arg0: i32) -> (i32, i32) {
    %c0_i32 = arith.constant 0 : i32
    %c0_i32_0 = arith.constant 0 : i32
    %c0_i32_1 = arith.constant 0 : i32
    return %c0_i32, %c0_i32_0 : i32, i32
  }
  func.func @transform_2(%arg0: i32) -> (i32, i32) {
    %c0_i32 = arith.constant 0 : i32
    %c0_i32_0 = arith.constant 0 : i32
    %c0_i32_1 = arith.constant 0 : i32
    return %c0_i32, %c0_i32_0 : i32, i32
  }
  func.func @transform_3(%arg0: i32) -> (i32, i32) {
    %c0_i32 = arith.constant 0 : i32
    %c0_i32_0 = arith.constant 0 : i32
    return %arg0, %c0_i32 : i32, i32
  }
}

</mosaic_0001>

<bundles_post_ra>
// kernel: tpu_custom_call.1
= control target key start
LH: loop header
LB: loop body
LE: loop exit
PB: predicated region body
PF: predicated region fallthrough
CT: control target
= control target key end

     0   :  { %8 = vsyncpa [#allocation3], 0  ;;  %s323_s0 = inlined_call_operand.hbm [shape: f32[8,32], index: 0, kind: input, shape index: {}]   ;;  %s324_s1 = inlined_call_operand.hbm [shape: f32[32,128], index: 1, kind: input, shape index: {}]   ;;  %s325_s2 = inlined_call_operand.vmem [shape: f32[1,128], index: 2, kind: input, shape index: {}]   ;;  %s326_s3 = inlined_call_operand.hbm [shape: f32[8,128], index: 3, kind: output, shape index: {}]  }
   0x1   :  { %9 = vsyncpa [#allocation6], 0 }
   0x2   :  { %10 = vsyncpa [#allocation4], 0  ;;  %s249_s12 = smov [#allocation2]   ;;  %s250_s14 = smov [#allocation5]  }
   0x3   :  { %s17_s13 = sshll.u32 %s249_s12, 4  ;;  %s26_s15 = sshll.u32 %s250_s14, 4  ;;  %s18_s13 = int_to_ptr.vmem [resolvable:$true] %s17_s13  ;;  %s277_s15 = int_to_ptr.vmem [resolvable:$true] %s26_s15 }
   0x4   :  { %s177_s18 = scalar_lea.hbm %s323_s0, 128 }
   0x5   :  { %p178_p0 = scmp.ne.s32.totalorder %s323_s0, %s177_s18  ;;  %p181_p1 = scmp.lt.u32.totalorder %s177_s18, %s323_s0 }
   0x7   :  { %p183_p2 = pnand %p181_p1, %p178_p0 }
   0x9   :  { %186 = shalt.err (!%p183_p2)
}
   0xa   :  { %s187_s23 = scalar_lea.vmem %s18_s13, 128  ;;  %p192_p4 = scmp.lt.s32.totalorder %s18_s13, %s18_s13 }
   0xb   :  { %p188_p3 = scmp.ne.s32.totalorder %s18_s13, %s187_s23  ;;  %p193_p5 = scmp.lt.s32.totalorder %s187_s23, %s187_s23 }
   0xd   :  { %p194_p6 = por %p193_p5, %p192_p4 }
   0xf   :  { %p195_p7 = pnand %p194_p6, %p188_p3 }
  0x11   :  { %198 = shalt.err (!%p195_p7)
}
  0x12   :  { %20 = dma.hbm_to_vmem [thread:$0]  %s323_s0, 128, %s18_s13, [#allocation3]  }
  0x13   :  { %s199_s28 = scalar_lea.hbm %s324_s1, 512 }
  0x14   :  { %p200_p8 = scmp.ne.s32.totalorder %s324_s1, %s199_s28  ;;  %p203_p9 = scmp.lt.u32.totalorder %s199_s28, %s324_s1 }
  0x16   :  { %p205_p10 = pnand %p203_p9, %p200_p8 }
  0x18   :  { %208 = shalt.err (!%p205_p10)
}
  0x19   :  { %s209_s6 = scalar_lea.vmem %s277_s15, 512  ;;  %p214_p12 = scmp.lt.s32.totalorder %s277_s15, %s277_s15 }
  0x1a   :  { %p210_p11 = scmp.ne.s32.totalorder %s277_s15, %s209_s6  ;;  %p215_p13 = scmp.lt.s32.totalorder %s209_s6, %s209_s6 }
  0x1c   :  { %p216_p0 = por %p215_p13, %p214_p12 }
  0x1e   :  { %p217_p1 = pnand %p216_p0, %p210_p11 }
  0x20   :  { %220 = shalt.err (!%p217_p1)
}
  0x21   :  { %s251_s0 = smov 128   ;;  %s252_s7 = smov 8  }
  0x22   :  { %32 = dma.hbm_to_vmem [thread:$0]  %s324_s1, 512, %s277_s15, [#allocation6], %s251_s0, %s251_s0, %s252_s7  }
  0x23   :  { %243 = dma.done.wait [#allocation3], 128  }
  0x24   :  { %244 = vsyncadd [#allocation3], 4294967168 }
  0x25   :  { %245 = dma.done.wait [#allocation6], 512  }
  0x26   :  { %246 = vsyncadd [#allocation6], 4294966784  ;;  %v253_v0 = vmov 0.0|0.0   ;;  %vm254_vm0 = vmmov 0   ;;  %v255_v1 = vmov 0.0   ;;  %v42_v2 = vld [vmem:[#allocation5] sm:$0xff] }
  0x27   :  { %163 = vmatprep.subr.bf16.mxu0 %v253_v0  ;;  %160 = vmatprep.mubr.msk.f32.mxu0 %vm254_vm0, %v255_v1  ;;  %v43_v3 = vld [vmem:[#allocation5 + $0x8] sm:$0xff]  ;;  %v44_v4 = vld [vmem:[#allocation5 + $0x10] sm:$0xff]  ;;  %v45_v6 = vld [vmem:[#allocation5 + $0x18] sm:$0xff]  ;;  %vm53_vm1 = vcmask 261120   ;;  %s256_s11 = smov [#allocation7]  }
  0x28   :  { %v164_v5 = vpack.c.bf16 %v43_v3, %v42_v2  ;;  %v167_v7 = vpack.c.bf16 %v45_v6, %v44_v4  ;;  %v41_v8 = vld [vmem:[#allocation2] sm:$0xff]  ;;  %s135_s12 = sshll.u32 %s256_s11, 4  ;;  %s136_s12 = int_to_ptr.vmem [resolvable:$true] %s135_s12 }
  0x29   :  { %v145_v9 = vld [vmem:[%s325_s2] ss:$0 sm:$0xff]  ;;  %s221_s13 = scalar_lea.vmem %s136_s12, 128  ;;  %p226_p3 = scmp.lt.s32.totalorder %s136_s12, %s136_s12 }
  0x2a   :  { %165 = vmatpush3.bf16.msra.mxu0 %v164_v5  ;;  %p222_p2 = scmp.ne.s32.totalorder %s136_s12, %s221_s13  ;;  %p227_p4 = scmp.lt.s32.totalorder %s221_s13, %s221_s13 }
  0x2b   :  { %166 = vmatprep.subr.bf16.mxu0 %v253_v0 }
  0x2c   :  { %p228_p5 = por %p227_p4, %p226_p3 }
  0x2e   :  { %168 = vmatpush3.bf16.msra.mxu0 %v167_v7  ;;  %p229_p6 = pnand %p228_p5, %p222_p2 }
  0x31   :  { %161 = vmatmul.mubr.msk.f32.vlgmr.msra.gmra.mrb[0].mxu0 %vm53_vm1, %v41_v8 }
 0x104   :  { %v123_v10 = vpop.f32.mrb[0].mxu0 }
 0x105   :  { %v124_v11 = vadd.f32 %v145_v9, %v123_v10  ;;  %v162_v12 = vpop.f32.mrb[1].mxu0 }
 0x107   :  { %v127_v13 = vmax.f32 %v124_v11, 0.0 }
 0x109   :  { %128 = vst [vmem:[#allocation7] sm:$0xff] %v127_v13 }
 0x10a   :  { %232 = shalt.err (!%p229_p6)
}
 0x10b   :  { %s233_s16 = scalar_lea.hbm %s326_s3, 128 }
 0x10c   :  { %p234_p7 = scmp.ne.s32.totalorder %s326_s3, %s233_s16  ;;  %p237_p8 = scmp.lt.u32.totalorder %s233_s16, %s326_s3 }
 0x10e   :  { %p239_p9 = pnand %p237_p8, %p234_p7 }
 0x110   :  { %242 = shalt.err (!%p239_p9)
}
 0x111   :  { %138 = dma.vmem_to_hbm [thread:$0]  %s136_s12, 128, %s326_s3, [#allocation4]  }
 0x112   :  { %247 = dma.done.wait [#allocation4], 128  }
 0x113   :  { %248 = vsyncadd [#allocation4], 4294967168 }
 0x114   :  { %142 = vsyncpa [#allocation3], 1 }
 0x115   :  { %143 = vsyncpa [#allocation6], 1 }
 0x116   :  { %144 = vsyncpa [#allocation4], 1 }

</bundles_post_ra>
